<compile_context>
chip_gen: v7x
topology: tpu7x:2x2x1
jax: 0.10.0
libtpu: 0.0.40
codegen_flags: <defaults>
</compile_context>

<pallas_src>
import jax
import jax.numpy as jnp
from jax.experimental import pallas as pl
from jax.experimental.pallas import tpu as pltpu

_LANE = 128
_SUBLANE = 8
# Arrays smaller than one vreg (8 x 128 elems) are pure launch overhead for an
# identity copy: skip the kernel for them.
_MIN_KERNEL_ELEMS = _SUBLANE * _LANE
# 4 MiB tiles -> <=16 MiB of double-buffered in+out, safe on every generation
# once the scoped VMEM limit is raised explicitly (see below).
_MAX_TILE_BYTES = 4 * 1024 * 1024
# Raise v5e's 16 MiB default scoped limit; comfortably inside v6e's 128 MiB
# and v7x's 64 MiB-per-TensorCore physical VMEM.
_VMEM_LIMIT_BYTES = 32 * 1024 * 1024


def _copy_kernel(x_ref, o_ref):
    # Identity: copy the current tile straight through.
    o_ref[...] = x_ref[...]


def _pick_lane_dense_shape(total):
    """Lane-dense (rows, lanes) view of the flat tensor, or None if lane-sparse."""
    if total % _LANE != 0:
        return None
    candidates = (2048, 1024, 512, 256, 128)
    # Prefer a factorization with at least a full sublane tile of rows.
    for lanes in candidates:
        if total % lanes == 0 and total // lanes >= _SUBLANE:
            return total // lanes, lanes
    for lanes in candidates:
        if total % lanes == 0:
            return total // lanes, lanes
    return None  # unreachable given the % 128 check, kept for clarity


def _choose_tile_rows(rows, lanes, itemsize):
    """Row-tile height: multiple of the packed sublane tile, bounded by VMEM,
    preferring an exact divisor of `rows` so no masked tail block is emitted."""
    # 8 sublanes for 32-bit, 16 for bf16/fp16, 32 for int8/fp8 (packed tiles).
    sub = max(_SUBLANE, 32 // max(itemsize, 1))
    row_bytes = lanes * itemsize
    max_rows = max(sub, _MAX_TILE_BYTES // row_bytes)
    if rows <= max_rows:
        return rows  # single full-extent tile: always a legal block
    tile = max(sub, (max_rows // sub) * sub)
    # Walk down in sublane-tile steps looking for an exact divisor of rows.
    t = tile
    while t > sub and rows % t != 0:
        t -= sub
    if rows % t == 0 and t * 2 >= tile:
        return t  # exact tiling, every block unmasked and lane-dense
    return tile  # accept a cdiv tail block (still correct)


@jax.jit
def _identity_copy(x):
    """Materialized identity copy via a Pallas streaming-copy kernel."""
    orig_shape = x.shape
    total = x.size
    itemsize = jnp.dtype(x.dtype).itemsize
    shape2d = _pick_lane_dense_shape(total)

    if total < _MIN_KERNEL_ELEMS or shape2d is None:
        # Sub-vreg or lane-sparse (size not a multiple of 128): a pallas_call
        # would be launch overhead / masked partial stores.  The forward is an
        # identity, so just pass the value through.
        # TODO(synk): if a materialized Pallas copy of unaligned shapes is ever
        # required, copy the 128-aligned prefix lane-dense and append the tail.
        return x

    rows, lanes = shape2d
    tile_r = _choose_tile_rows(rows, lanes, itemsize)
    x2 = x.reshape(rows, lanes)  # contiguous row-major reshape: a bitcast

    out = pl.pallas_call(
        _copy_kernel,
        out_shape=jax.ShapeDtypeStruct((rows, lanes), x.dtype),
        grid=(pl.cdiv(rows, tile_r),),
        in_specs=[pl.BlockSpec((tile_r, lanes), lambda i: (i, 0))],
        out_specs=pl.BlockSpec((tile_r, lanes), lambda i: (i, 0)),
        # Pure bandwidth: 0 flops, read + write of the whole tensor.
        cost_estimate=pl.CostEstimate(
            flops=0, transcendentals=0, bytes_accessed=2 * total * itemsize
        ),
        compiler_params=pltpu.CompilerParams(
            # Row tiles are independent.  TODO(synk): on v7x, confirm via
            # xprof that both TensorCores are used; switch to
            # pltpu.CORE_PARALLEL if one TC sits idle.
            dimension_semantics=("parallel",),
            vmem_limit_bytes=_VMEM_LIMIT_BYTES,
        ),
    )(x2)
    return out.reshape(orig_shape)


class Print:
    """Pallas/JAX port of the PyTorch `Print` module."""

    dump = False

    def __init__(self, name=""):
        self.name = name

    def __call__(self, x, *, materialize=False):
        if Print.dump:
            # Host-side log mirroring `info((self.name, x.shape))`; the shape
            # is static under jit so a trace-time print suffices.
            print((self.name, tuple(x.shape)))
        if not materialize:
            # Hot path: pure identity — no kernel launch, no HBM round trip.
            return x
        return _identity_copy(x)


def print_forward(x, name=""):
    """Functional form of Print(name).forward(x): identity pass-through."""
    return Print(name)(x)


if __name__ == "__main__":
    key = jax.random.PRNGKey(0)
    # Small NCHW input consistent with a typical conv-net feature map.
    x = jax.random.normal(key, (2, 4, 16, 16), dtype=jnp.float32)

    printer = Print(name="debug_print")

    # Hot path (matches Print.forward): identity, no kernel launch.
    y_fast = printer(x)

    # Materialized path: exercises the Pallas identity-copy kernel once.
    y_copy = printer(x, materialize=True)
    y_copy = jax.block_until_ready(y_copy)

    assert y_fast.shape == x.shape and y_fast.dtype == x.dtype
    assert y_copy.shape == x.shape and y_copy.dtype == x.dtype
    assert bool(jnp.all(y_fast == x))
    assert bool(jnp.all(y_copy == x))
    print("KERNEL_OK")
</pallas_src>

<mosaic_0001>
module attributes {stable_mosaic.version = 11 : i64} {
  func.func @_copy_kernel(%arg0: i32, %arg1: memref<8x256xf32, #tpu.memory_space<vmem>>, %arg2: memref<8x256xf32, #tpu.memory_space<vmem>>) attributes {dimension_semantics = [#tpu.dimension_semantics<parallel>], iteration_bounds = array<i64: 1>, scalar_prefetch = 0 : i64, scratch_operands = 0 : i64, tpu.core_type = #tpu.core_type<tc>, window_params = [{transform_indices = @transform_0, window_bounds = array<i64: 8, 256>}, {transform_indices = @transform_1, window_bounds = array<i64: 8, 256>}]} {
    %c0 = arith.constant 0 : index
    %c0_0 = arith.constant 0 : index
    %0 = vector.load %arg1[%c0, %c0_0] : memref<8x256xf32, #tpu.memory_space<vmem>>, vector<8x256xf32>
    %c0_1 = arith.constant 0 : index
    %c0_2 = arith.constant 0 : index
    %1 = vector.load %arg2[%c0_1, %c0_2] : memref<8x256xf32, #tpu.memory_space<vmem>>, vector<8x256xf32>
    tpu.vector_store %arg2[%c0_1, %c0_2], %0 {strides = array<i32>} : memref<8x256xf32, #tpu.memory_space<vmem>>, vector<8x256xf32>,
    return
  }
  func.func @transform_0(%arg0: i32) -> (i32, i32) {
    %c0_i32 = arith.constant 0 : i32
    %c0_i32_0 = arith.constant 0 : i32
    return %arg0, %c0_i32 : i32, i32
  }
  func.func @transform_1(%arg0: i32) -> (i32, i32) {
    %c0_i32 = arith.constant 0 : i32
    %c0_i32_0 = arith.constant 0 : i32
    return %arg0, %c0_i32 : i32, i32
  }
}

</mosaic_0001>

<bundles_post_ra>
// kernel: _identity_copy.1
= control target key start
LH: loop header
LB: loop body
LE: loop exit
PB: predicated region body
PF: predicated region fallthrough
CT: control target
= control target key end

     0   :  { %s38_s0 = inlined_call_operand.vmem [shape: f32[8,256], index: 0, kind: input, shape index: {}]   ;;  %s39_s1 = inlined_call_operand.vmem [shape: f32[8,256], index: 1, kind: output, shape index: {}]  }
   0x1   :  { %v8_v0 = vld [vmem:[%s38_s0] sm:$0xff]  ;;  %v9_v1 = vld [vmem:[%s38_s0 + $0x8] sm:$0xff] }
   0x2   :  { %10 = vst [vmem:[%s39_s1] sm:$0xff] %v8_v0  ;;  %11 = vst [vmem:[%s39_s1 + $0x8] sm:$0xff] %v9_v1 }

</bundles_post_ra>
